<compile_context>
chip_gen: v7x
topology: tpu7x:2x2x1
jax: 0.10.0
libtpu: 0.0.40
codegen_flags: <defaults>
</compile_context>

<pallas_src>
import jax
import jax.numpy as jnp
from jax.experimental import pallas as pl
from jax.experimental.pallas import tpu as pltpu


def _seq_fnn_kernel(x_ref, w_ref, b_ref, o_ref):
    # x_ref: (F_in, TILE_S)  slice of conv_embed[b] in native NCW layout
    # w_ref: (F_out, F_in)   folded weight  W2 @ W1
    # b_ref: (F_out, 1)      folded bias    W2 @ b1 + b2
    # o_ref: (F_out, TILE_S) lane-dense output tile
    y = jnp.dot(w_ref[...], x_ref[...], preferred_element_type=jnp.float32)
    o_ref[...] = (y + b_ref[...]).astype(o_ref.dtype)


def _pick_tile_s(S: int, F_in: int, F_out: int, itemsize: int,
                 vmem_budget: int = 24 << 20, cap: int = 2048) -> int:
    """Largest S-tile (multiple of 128, or full S) whose double-buffered
    input+output tiles fit comfortably in VMEM on every chip generation."""
    if S <= 512:
        return S                       # full-extent block: always legal
    bytes_per_col = (F_in + F_out) * itemsize * 2   # x2: double buffering
    max_cols = max(128, vmem_budget // max(bytes_per_col, 1))
    tile = min(S, cap, max_cols)
    if tile != S:
        tile = max(128, (tile // 128) * 128)        # lane-dim 128-multiple
    return tile


def sequential_fnn(conv_embed, w1, b1, w2, b2):
    """conv_embed: (B, cnn_features*5, S) -> (B, S, cnn_features//2)."""
    B, F_in, S = conv_embed.shape
    H = w1.shape[0]
    F_out = w2.shape[0]
    assert w1.shape == (H, F_in) and w2.shape == (F_out, H)
    assert b1.shape == (H,) and b2.shape == (F_out,)

    # Fold the two activation-free Linear layers:
    #   y = (x @ W1^T + b1) @ W2^T + b2 = x @ (W2 @ W1)^T + (W2 @ b1 + b2)
    w_f = jnp.dot(w2, w1, preferred_element_type=jnp.float32)          # (F_out, F_in)
    b_f = jnp.dot(w2, b1, preferred_element_type=jnp.float32) + b2     # (F_out,)
    w_f = w_f.astype(conv_embed.dtype)
    b_f = b_f.reshape(F_out, 1).astype(conv_embed.dtype)

    itemsize = jnp.dtype(conv_embed.dtype).itemsize
    tile_s = _pick_tile_s(S, F_in, F_out, itemsize)
    grid = (B, pl.cdiv(S, tile_s))

    cost = pl.CostEstimate(
        flops=2 * B * S * F_in * F_out,
        transcendentals=0,
        bytes_accessed=(conv_embed.size + B * S * F_out + w_f.size + b_f.size)
        * itemsize,
    )

    out_ncs = pl.pallas_call(
        _seq_fnn_kernel,
        out_shape=jax.ShapeDtypeStruct((B, F_out, S), conv_embed.dtype),
        grid=grid,
        in_specs=[
            # conv_embed read in its native (B, F_in, S) layout; the batch dim
            # is squeezed out of the kernel view.
            pl.BlockSpec((None, F_in, tile_s), lambda b, s: (b, 0, s)),
            # Constant block index => weight/bias stay resident in VMEM.
            pl.BlockSpec((F_out, F_in), lambda b, s: (0, 0)),
            pl.BlockSpec((F_out, 1), lambda b, s: (0, 0)),
        ],
        out_specs=pl.BlockSpec((None, F_out, tile_s), lambda b, s: (b, 0, s)),
        compiler_params=pltpu.CompilerParams(
            dimension_semantics=("parallel", "parallel"),
            vmem_limit_bytes=32 << 20,  # safe on v7x's 64 MiB physical VMEM
        ),
        cost_estimate=cost,
    )(conv_embed, w_f, b_f)

    # Only the (much smaller) output gets transposed back to (B, S, F_out).
    return jnp.transpose(out_ncs, (0, 2, 1))


if __name__ == "__main__":
    # config (matches the module: F_in = 5*cnn_features, H = cnn_features,
    # F_out = cnn_features // 2)
    cnn_features = 32
    B, S = 2, 8
    F_in = cnn_features * 5          # 160
    H = cnn_features                 # 32
    F_out = cnn_features // 2        # 16

    key = jax.random.PRNGKey(0)
    k_x, k_w1, k_b1, k_w2, k_b2 = jax.random.split(key, 5)

    conv_embed = jax.random.normal(k_x, (B, F_in, S), dtype=jnp.float32)

    # Deterministic parameter init (mimics nn.Linear uniform(-1/sqrt(in), 1/sqrt(in))).
    bound1 = 1.0 / (F_in ** 0.5)
    w1 = jax.random.uniform(k_w1, (H, F_in), minval=-bound1, maxval=bound1,
                            dtype=jnp.float32)
    b1 = jax.random.uniform(k_b1, (H,), minval=-bound1, maxval=bound1,
                            dtype=jnp.float32)
    bound2 = 1.0 / (H ** 0.5)
    w2 = jax.random.uniform(k_w2, (F_out, H), minval=-bound2, maxval=bound2,
                            dtype=jnp.float32)
    b2 = jax.random.uniform(k_b2, (F_out,), minval=-bound2, maxval=bound2,
                            dtype=jnp.float32)

    out = sequential_fnn(conv_embed, w1, b1, w2, b2)
    out = jax.block_until_ready(out)

    # Pure-JAX reference of the original (unfolded) module semantics.
    x_ref = jnp.transpose(conv_embed, (0, 2, 1))
    ref = (x_ref @ w1.T + b1) @ w2.T + b2
    assert out.shape == (B, S, F_out), out.shape
    assert jnp.allclose(out, ref, atol=5e-4, rtol=5e-4), \
        float(jnp.max(jnp.abs(out - ref)))

    print("KERNEL_OK")
</pallas_src>

<mosaic_0001>
module attributes {stable_mosaic.version = 11 : i64} {
  func.func @_seq_fnn_kernel(%arg0: i32, %arg1: i32, %arg2: memref<1x160x8xf32, #tpu.memory_space<vmem>>, %arg3: memref<16x160xf32, #tpu.memory_space<vmem>>, %arg4: memref<16x1xf32, #tpu.memory_space<vmem>>, %arg5: memref<1x16x8xf32, #tpu.memory_space<vmem>>) attributes {dimension_semantics = [#tpu.dimension_semantics<parallel>, #tpu.dimension_semantics<parallel>], iteration_bounds = array<i64: 2, 1>, scalar_prefetch = 0 : i64, scratch_operands = 0 : i64, tpu.core_type = #tpu.core_type<tc>, window_params = [{transform_indices = @transform_0, window_bounds = array<i64: 1, 160, 8>}, {pipeline_mode = #tpu.pipeline_mode<synchronous>, transform_indices = @transform_1, window_bounds = array<i64: 16, 160>}, {pipeline_mode = #tpu.pipeline_mode<synchronous>, transform_indices = @transform_2, window_bounds = array<i64: 16, 1>}, {transform_indices = @transform_3, window_bounds = array<i64: 1, 16, 8>}]} {
    %c0 = arith.constant 0 : index
    %c0_0 = arith.constant 0 : index
    %0 = vector.load %arg3[%c0, %c0_0] : memref<16x160xf32, #tpu.memory_space<vmem>>, vector<16x160xf32>
    %c0_1 = arith.constant 0 : index
    %c0_2 = arith.constant 0 : index
    %c0_3 = arith.constant 0 : index
    %1 = vector.load %arg2[%c0_1, %c0_2, %c0_3] : memref<1x160x8xf32, #tpu.memory_space<vmem>>, vector<1x160x8xf32>
    %2 = vector.shape_cast %1 : vector<1x160x8xf32> to vector<160x8xf32>
    %cst = arith.constant dense<0.000000e+00> : vector<16x8xf32>
    %3 = tpu.matmul %0, %2, %cst {dimension_numbers = #tpu.dot_dimension_numbers<[1], [0], [0], [1], [0, 0, 1, 1], [], []>} : vector<16x160xf32>, vector<160x8xf32>, vector<16x8xf32> -> vector<16x8xf32>
    %c0_4 = arith.constant 0 : index
    %c0_5 = arith.constant 0 : index
    %4 = vector.load %arg4[%c0_4, %c0_5] : memref<16x1xf32, #tpu.memory_space<vmem>>, vector<16x1xf32>
    %5 = vector.broadcast %4 : vector<16x1xf32> to vector<16x8xf32>
    %6 = arith.addf %3, %5 : vector<16x8xf32>
    %c0_6 = arith.constant 0 : index
    %c0_7 = arith.constant 0 : index
    %c0_8 = arith.constant 0 : index
    %7 = vector.load %arg5[%c0_6, %c0_7, %c0_8] : memref<1x16x8xf32, #tpu.memory_space<vmem>>, vector<1x16x8xf32>
    %8 = vector.shape_cast %7 : vector<1x16x8xf32> to vector<16x8xf32>
    %9 = vector.shape_cast %6 : vector<16x8xf32> to vector<1x16x8xf32>
    tpu.vector_store %arg5[%c0_6, %c0_7, %c0_8], %9 {strides = array<i32>} : memref<1x16x8xf32, #tpu.memory_space<vmem>>, vector<1x16x8xf32>,
    return
  }
  func.func @transform_0(%arg0: i32, %arg1: i32) -> (i32, i32, i32) {
    %c0_i32 = arith.constant 0 : i32
    %c0_i32_0 = arith.constant 0 : i32
    return %arg0, %c0_i32, %arg1 : i32, i32, i32
  }
  func.func @transform_1(%arg0: i32, %arg1: i32) -> (i32, i32) {
    %c0_i32 = arith.constant 0 : i32
    %c0_i32_0 = arith.constant 0 : i32
    %c0_i32_1 = arith.constant 0 : i32
    return %c0_i32, %c0_i32_0 : i32, i32
  }
  func.func @transform_2(%arg0: i32, %arg1: i32) -> (i32, i32) {
    %c0_i32 = arith.constant 0 : i32
    %c0_i32_0 = arith.constant 0 : i32
    %c0_i32_1 = arith.constant 0 : i32
    return %c0_i32, %c0_i32_0 : i32, i32
  }
  func.func @transform_3(%arg0: i32, %arg1: i32) -> (i32, i32, i32) {
    %c0_i32 = arith.constant 0 : i32
    %c0_i32_0 = arith.constant 0 : i32
    return %arg0, %c0_i32, %arg1 : i32, i32, i32
  }
}

</mosaic_0001>

<bundles_post_ra>
// kernel: tpu_custom_call.1
= control target key start
LH: loop header
LB: loop body
LE: loop exit
PB: predicated region body
PF: predicated region fallthrough
CT: control target
= control target key end

     0   :  { %s543_s12 = smov 0   ;;  %s545_s13 = smov 0   ;;  %s640_s0 = inlined_call_operand.vmem [shape: f32[2,160,8], index: 0, kind: input, shape index: {}]   ;;  %s641_s1 = inlined_call_operand.vmem [shape: f32[16,160], index: 1, kind: input, shape index: {}]   ;;  %s642_s2 = inlined_call_operand.vmem [shape: f32[16,1], index: 2, kind: input, shape index: {}]   ;;  %s643_s3 = inlined_call_operand.vmem [shape: f32[2,16,8], index: 3, kind: output, shape index: {}]  }
   0x1   :  { %s547_s14 = smov 0  }
   0x2 LB: > { %s25_s15 = sadd.s32 1, %s515_s13  ;;  %p410_p0 = scmp.ge.s32.totalorder %s519_s14, 1  ;;  %s519_s14 = sphi %s547_s14, %s13_s14   ;;  %s515_s13 = sphi %s545_s13, %s645_s13   ;;  %s511_s12 = sphi %s543_s12, %s644_s12  }
   0x3   : > { %p27_p1 = scmp.ge.s32.totalorder %s25_s15, 2  ;;  %p156_p2 = scmp.lt.s32.totalorder %s519_s14, 3 }
   0x5   : > { %s647_s15 = smov (%p27_p1, %s25_s15), 0  ;;  %p157_p3 = pnand %p410_p0, %p156_p2 }
   0x6   : > { %p186_p4 = scmp.lt.s32.totalorder (!%p157_p3), %s511_s12, 1  ;;  %v203_v0 = vld [vmem:[%s641_s1 + $0x8] sm:$0xff] (!%p157_p3)  ;;  %vm238_vm0 = vcmask (!%p157_p3), 261120   ;;  %v205_v1 = vld [vmem:[%s641_s1 + $0x18] sm:$0xff] (!%p157_p3)  ;;  %v521_v2 = vmov (!%p157_p3), 0.0|0.0   ;;  %v226_v3 = vld [vmem:[%s642_s2] sm:$0xff] (!%p157_p3) }
   0x7   : > { %160 = sbr.rel (%p157_p3) target bundleno = 275 (0x113), region = 32  ;;  %419 = vmatprep.subr.bf16.mxu0 (!%p157_p3), %v521_v2  ;;  %449 = vmatprep.subr.bf16.mxu1 (!%p157_p3), %v521_v2  ;;  %v522_v4 = vmov (!%p157_p3), 0   ;;  %v227_v5 = vld [vmem:[%s642_s2 + $0x8] sm:$0xff] (!%p157_p3)  ;;  %v202_v36 = vld [vmem:[%s641_s1] sm:$0xff] (!%p157_p3)  ;;  %v204_v37 = vld [vmem:[%s641_s1 + $0x10] sm:$0xff] (!%p157_p3)  ;;  %vm320_vm1 = vcmask (!%p157_p3), 64512  }
   0x8   : > { %414 = vmatprep.mubr.msk.f32.mxu0 (!%p157_p3), %vm238_vm0, %v203_v0  ;;  %415 = vmatprep.mubr.msk.f32.mxu1 (!%p157_p3), %vm238_vm0, %v205_v1 }
   0x9   : > { %496 = vset.pattern.permute.xlu0 (!%p157_p3), %v522_v4 }
   0xa   : > { %230 = vperm.xlu0 (!%p157_p3), %496, %v226_v3  }
   0xe   : > { %s649_s12 = smov (!%p186_p4, %s511_s12), 1  ;;  %235 = vperm.xlu0 %496, %v227_v5  }
   0xf   : > { %s469_s22 = smul.u32 160, %s649_s12  ;;  %s418_s5 = sshll.u32 %s649_s12, 4 }
  0x10   : > { %s201_s8 = scalar_lea.vmem %s643_s3, %s418_s5 }
  0x11   : > { %s581_s27 = scalar_lea.vmem %s640_s0, %s469_s22 }
  0x12   : > { %v206_v6 = vld [vmem:[%s581_s27] sm:$0xff]  ;;  %v207_v7 = vld [vmem:[%s581_s27 + $0x8] sm:$0xff]  ;;  %v208_v8 = vld [vmem:[%s581_s27 + $0x10] sm:$0xff] }
  0x13   : > { %v420_v9 = vpack.c.bf16 %v207_v7, %v206_v6  ;;  %v209_v10 = vld [vmem:[%s581_s27 + $0x18] sm:$0xff]  ;;  %v210_v12 = vld [vmem:[%s581_s27 + $0x20] sm:$0xff]  ;;  %v211_v13 = vld [vmem:[%s581_s27 + $0x28] sm:$0xff] }
  0x14   : > { %v423_v11 = vpack.c.bf16 %v209_v10, %v208_v8  ;;  %v426_v14 = vpack.c.bf16 %v211_v13, %v210_v12  ;;  %v212_v15 = vld [vmem:[%s581_s27 + $0x30] sm:$0xff]  ;;  %v213_v16 = vld [vmem:[%s581_s27 + $0x38] sm:$0xff]  ;;  %v214_v18 = vld [vmem:[%s581_s27 + $0x40] sm:$0xff] }
  0x15   : > { %421 = vmatpush1.bf16.msra.mxu0 %v420_v9  ;;  %459 = vmatpush1.bf16.msra.mxu1 %v420_v9  ;;  %v429_v17 = vpack.c.bf16 %v213_v16, %v212_v15  ;;  %v215_v19 = vld [vmem:[%s581_s27 + $0x48] sm:$0xff]  ;;  %v216_v21 = vld [vmem:[%s581_s27 + $0x50] sm:$0xff]  ;;  %v217_v22 = vld [vmem:[%s581_s27 + $0x58] sm:$0xff] }
  0x16   : > { %422 = vmatprep.subr.bf16.mxu0 %v521_v2  ;;  %450 = vmatprep.subr.bf16.mxu1 %v521_v2  ;;  %v432_v20 = vpack.c.bf16 %v215_v19, %v214_v18  ;;  %v435_v23 = vpack.c.bf16 %v217_v22, %v216_v21  ;;  %v218_v24 = vld [vmem:[%s581_s27 + $0x60] sm:$0xff]  ;;  %v219_v25 = vld [vmem:[%s581_s27 + $0x68] sm:$0xff]  ;;  %v220_v27 = vld [vmem:[%s581_s27 + $0x70] sm:$0xff] }
  0x17   : > { %v438_v26 = vpack.c.bf16 %v219_v25, %v218_v24  ;;  %v221_v28 = vld [vmem:[%s581_s27 + $0x78] sm:$0xff]  ;;  %v222_v30 = vld [vmem:[%s581_s27 + $0x80] sm:$0xff]  ;;  %v223_v31 = vld [vmem:[%s581_s27 + $0x88] sm:$0xff] }
  0x18   : > { %v441_v29 = vpack.c.bf16 %v221_v28, %v220_v27  ;;  %v444_v32 = vpack.c.bf16 %v223_v31, %v222_v30  ;;  %v224_v33 = vld [vmem:[%s581_s27 + $0x90] sm:$0xff]  ;;  %v225_v34 = vld [vmem:[%s581_s27 + $0x98] sm:$0xff] }
  0x19   : > { %424 = vmatpush1.bf16.msra.mxu0 %v423_v11  ;;  %460 = vmatpush1.bf16.msra.mxu1 %v423_v11  ;;  %v447_v35 = vpack.c.bf16 %v225_v34, %v224_v33 }
  0x1a   : > { %425 = vmatprep.subr.bf16.mxu0 %v521_v2  ;;  %451 = vmatprep.subr.bf16.mxu1 %v521_v2 }
  0x1d   : > { %427 = vmatpush1.bf16.msra.mxu0 %v426_v14  ;;  %461 = vmatpush1.bf16.msra.mxu1 %v426_v14 }
  0x1e   : > { %428 = vmatprep.subr.bf16.mxu0 %v521_v2  ;;  %452 = vmatprep.subr.bf16.mxu1 %v521_v2 }
  0x21   : > { %430 = vmatpush1.bf16.msra.mxu0 %v429_v17  ;;  %462 = vmatpush1.bf16.msra.mxu1 %v429_v17 }
  0x22   : > { %431 = vmatprep.subr.bf16.mxu0 %v521_v2  ;;  %453 = vmatprep.subr.bf16.mxu1 %v521_v2 }
  0x25   : > { %433 = vmatpush1.bf16.msra.mxu0 %v432_v20  ;;  %463 = vmatpush1.bf16.msra.mxu1 %v432_v20 }
  0x26   : > { %434 = vmatprep.subr.bf16.mxu0 %v521_v2  ;;  %454 = vmatprep.subr.bf16.mxu1 %v521_v2 }
  0x29   : > { %436 = vmatpush1.bf16.msra.mxu0 %v435_v23  ;;  %464 = vmatpush1.bf16.msra.mxu1 %v435_v23 }
  0x2a   : > { %437 = vmatprep.subr.bf16.mxu0 %v521_v2  ;;  %455 = vmatprep.subr.bf16.mxu1 %v521_v2 }
  0x2d   : > { %439 = vmatpush1.bf16.msra.mxu0 %v438_v26  ;;  %465 = vmatpush1.bf16.msra.mxu1 %v438_v26 }
  0x2e   : > { %440 = vmatprep.subr.bf16.mxu0 %v521_v2  ;;  %456 = vmatprep.subr.bf16.mxu1 %v521_v2 }
  0x31   : > { %442 = vmatpush1.bf16.msra.mxu0 %v441_v29  ;;  %466 = vmatpush1.bf16.msra.mxu1 %v441_v29 }
  0x32   : > { %443 = vmatprep.subr.bf16.mxu0 %v521_v2  ;;  %457 = vmatprep.subr.bf16.mxu1 %v521_v2 }
  0x35   : > { %445 = vmatpush1.bf16.msra.mxu0 %v444_v32  ;;  %467 = vmatpush1.bf16.msra.mxu1 %v444_v32 }
  0x36   : > { %446 = vmatprep.subr.bf16.mxu0 %v521_v2  ;;  %458 = vmatprep.subr.bf16.mxu1 %v521_v2 }
  0x39   : > { %448 = vmatpush1.bf16.msra.mxu0 %v447_v35  ;;  %468 = vmatpush1.bf16.msra.mxu1 %v447_v35 }
  0x3c   : > { %310 = vmatmul.mubr.f32.vlgmr.msra.gmra.mrb[0].mxu0 %v202_v36  ;;  %315 = vmatmul.mubr.f32.vlgmr.msra.gmra.mrb[0].mxu1 %v204_v37 }
  0x89   : > { %v231_v38 = vpop.permute.xlu0 %230 }
  0x8d   : > { %v236_v39 = vpop.permute.xlu0 %235 }
 0x10f   : > { %v311_v40 = vpop.f32.mrb[0].mxu0  ;;  %v316_v41 = vpop.f32.mrb[0].mxu1 }
 0x110   : > { %v312_v42 = vadd.f32 %v311_v40, %v231_v38  ;;  %v317_v43 = vadd.f32 %v316_v41, %v236_v39  ;;  %v313_v44 = vpop.f32.mrb[1].mxu0  ;;  %v318_v45 = vpop.f32.mrb[1].mxu1 }
 0x112   : > { %321 = vst.msk [vmem:[%s201_s8] sm:$0xff] %vm320_vm1, %v312_v42  ;;  %322 = vst.msk [vmem:[%s201_s8 + $0x8] sm:$0xff] %vm320_vm1, %v317_v43 }
 0x113 PF: > { %s13_s14 = sadd.s32 1, %s519_s14   ;;  %s644_s12 = smov %s515_s13 }
 0x114   : > { %p10_p5 = scmp.ge.s32.totalorder %s13_s14, 4   ;;  %s645_s13 = smov %s647_s15 }
 0x116   :  { %12 = sbr.rel (!%p10_p5) target bundleno = 2 (0x2), region = 62 }

</bundles_post_ra>
